<compile_context>
chip_gen: v7x
topology: tpu7x:2x2x1
jax: 0.10.0
libtpu: 0.0.40
codegen_flags: <defaults>
</compile_context>

<pallas_src>
from math import sqrt

import jax
import jax.numpy as jnp
from jax.experimental import pallas as pl
from jax.experimental.pallas import tpu as pltpu


def _broadcast_kernel(slots_ref, out_ref):
    # slots_ref: (1, tf)   lane-dense learned-parameter tile (resident across grid)
    # out_ref:   (tb, tf)  output tile for tb batch rows
    out_ref[...] = jnp.broadcast_to(slots_ref[...], out_ref.shape)


def _round_up(x: int, m: int) -> int:
    return ((x + m - 1) // m) * m


def _vmem_capacity_bytes() -> int:
    try:
        return int(pltpu.get_tpu_info().vmem_capacity_bytes)
    except Exception:
        return 128 * 1024 * 1024  # v5e/v6e physical VMEM; conservative fallback


def learned_init_forward(
    initial_slots: jax.Array,
    batch_size: int,
    *,
    materialize: bool = True,
    max_block_bytes: int | None = None,
) -> jax.Array:
    """Pallas equivalent of Learned.forward(batch_size).

    initial_slots: (1, num_slots, slot_dim) learned parameter.
    returns:       (batch_size, num_slots, slot_dim)
    """
    _, num_slots, slot_dim = initial_slots.shape
    feat = num_slots * slot_dim
    dtype = initial_slots.dtype
    itemsize = jnp.dtype(dtype).itemsize

    if not materialize:
        # Fast path: let XLA fuse the broadcast into the consumer -> zero HBM
        # traffic for this op (PyTorch .expand() is also a view).
        return jnp.broadcast_to(initial_slots, (batch_size, num_slots, slot_dim))

    # Lane-dense 2-D view of the parameter, padded so the last dim is a
    # multiple of 128 (keeps every output store a full-width unmasked vst).
    feat_padded = _round_up(feat, 128)
    slots_2d = initial_slots.reshape(1, feat)
    if feat_padded != feat:
        slots_2d = jnp.pad(slots_2d, ((0, 0), (0, feat_padded - feat)))

    # dtype-aware sublane packing: f32 -> 8 rows/vreg, bf16 -> 16, int8/fp8 -> 32.
    pack = max(8, 32 // itemsize)

    # Generation-aware per-block budget: at most 1/8 of physical VMEM and never
    # more than 8 MiB (double-buffered output = 16 MiB -> safe on v7x's 64 MiB).
    vmem_cap = _vmem_capacity_bytes()
    if max_block_bytes is None:
        max_block_bytes = min(8 * 1024 * 1024, vmem_cap // 8)
    max_block_bytes = max(max_block_bytes, 128 * itemsize * pack)  # always >= 1 tile

    # Feature-axis block: whole (padded) feature dim if one packed row-group
    # fits the budget; otherwise the largest 128-multiple that does (guards the
    # large-num_slots*slot_dim case from overflowing VMEM on v7x).
    if pack * feat_padded * itemsize <= max_block_bytes:
        tf = feat_padded
    else:
        tf = max(128, (max_block_bytes // (pack * itemsize * 128)) * 128)

    # Batch-axis block, rounded to the dtype's sublane packing.
    max_rows = max(pack, max_block_bytes // max(tf * itemsize, 1))
    if batch_size <= max_rows:
        tb = batch_size  # full-extent block along batch -> always legal
    else:
        tb = max(pack, (max_rows // pack) * pack)

    grid = (pl.cdiv(batch_size, tb), pl.cdiv(feat_padded, tf))

    # Explicit scoped-VMEM limit: double-buffered output block + the (tiny)
    # resident parameter tile + headroom; clamped to physical capacity.
    block_bytes = tb * tf * itemsize
    param_tile_bytes = 8 * tf * itemsize  # sublane-padded parameter row
    vmem_limit = min(
        vmem_cap,
        max(16 * 1024 * 1024, 2 * block_bytes + 2 * param_tile_bytes + (2 << 20)),
    )

    cost = pl.CostEstimate(
        flops=0,
        transcendentals=0,
        bytes_accessed=batch_size * feat_padded * itemsize + feat_padded * itemsize,
    )

    out_2d = pl.pallas_call(
        _broadcast_kernel,
        out_shape=jax.ShapeDtypeStruct((batch_size, feat_padded), dtype),
        grid_spec=pltpu.PrefetchScalarGridSpec(
            num_scalar_prefetch=0,
            grid=grid,
            in_specs=[
                # Same parameter tile (along batch) reused at every batch step;
                # marches along the feature axis only.
                pl.BlockSpec((1, tf), lambda b, f: (0, f)),
            ],
            out_specs=pl.BlockSpec((tb, tf), lambda b, f: (b, f)),
        ),
        compiler_params=pltpu.CompilerParams(
            # Always-fill kernel body -> safe to shard both axes across
            # TensorCores on v7x; no-op on v5e/v6e.
            dimension_semantics=("parallel", "parallel"),
            vmem_limit_bytes=int(vmem_limit),
        ),
        cost_estimate=cost,
    )(slots_2d)

    if feat_padded != feat:
        out_2d = out_2d[:, :feat]

    # Free layout plumbing back to the module's (B, num_slots, slot_dim) shape.
    return out_2d.reshape(batch_size, num_slots, slot_dim)


def make_learned_params(key, num_slots: int, slot_dim: int, dtype=jnp.float32):
    """Deterministic parameter init matching the PyTorch module's __init__."""
    limit = sqrt(6.0 / (1 + slot_dim))
    return jax.random.uniform(
        key, (1, num_slots, slot_dim), dtype=jnp.float32, minval=-limit, maxval=limit
    ).astype(dtype)


if __name__ == "__main__":
    key = jax.random.PRNGKey(0)

    # --- default config: num_slots=8, slot_dim=32, batch=2 (feat = 256) ---
    num_slots, slot_dim, batch_size = 8, 32, 2
    initial_slots = make_learned_params(key, num_slots, slot_dim)

    out = jax.block_until_ready(learned_init_forward(initial_slots, batch_size))
    ref = jnp.broadcast_to(initial_slots, (batch_size, num_slots, slot_dim))
    assert out.shape == (batch_size, num_slots, slot_dim)
    assert out.dtype == initial_slots.dtype
    assert jnp.array_equal(out, ref)

    # --- multi-block, ragged batch (small block budget forces several steps) ---
    big_b = 4099
    out_big = jax.block_until_ready(
        learned_init_forward(initial_slots, big_b, max_block_bytes=64 * 1024)
    )
    ref_big = jnp.broadcast_to(initial_slots, (big_b, num_slots, slot_dim))
    assert jnp.array_equal(out_big, ref_big)

    # --- non-128-multiple feature dim exercises the lane-padding path ---
    slots_odd = make_learned_params(jax.random.PRNGKey(1), 7, 33)  # feat = 231
    out_odd = jax.block_until_ready(learned_init_forward(slots_odd, 5))
    ref_odd = jnp.broadcast_to(slots_odd, (5, 7, 33))
    assert jnp.array_equal(out_odd, ref_odd)

    # --- bf16 exercises dtype-aware sublane packing + 2-D (batch, feat) grid ---
    slots_bf16 = make_learned_params(jax.random.PRNGKey(2), 8, 32, dtype=jnp.bfloat16)
    out_bf16 = jax.block_until_ready(
        learned_init_forward(slots_bf16, 100, max_block_bytes=4096)
    )
    ref_bf16 = jnp.broadcast_to(slots_bf16, (100, 8, 32))
    assert out_bf16.dtype == jnp.bfloat16
    assert jnp.array_equal(out_bf16, ref_bf16)

    # --- fusion fast path (no Pallas materialization) ---
    out_fast = jax.block_until_ready(
        learned_init_forward(initial_slots, batch_size, materialize=False)
    )
    assert jnp.array_equal(out_fast, ref)

    print("KERNEL_OK")
</pallas_src>

<mosaic_0001>
module attributes {stable_mosaic.version = 11 : i64} {
  func.func @_broadcast_kernel(%arg0: i32, %arg1: i32, %arg2: memref<1x256xf32, #tpu.memory_space<vmem>>, %arg3: memref<2x256xf32, #tpu.memory_space<vmem>>) attributes {dimension_semantics = [#tpu.dimension_semantics<parallel>, #tpu.dimension_semantics<parallel>], iteration_bounds = array<i64: 1, 1>, scalar_prefetch = 0 : i64, scratch_operands = 0 : i64, tpu.core_type = #tpu.core_type<tc>, window_params = [{transform_indices = @transform_0, window_bounds = array<i64: 1, 256>}, {transform_indices = @transform_1, window_bounds = array<i64: 2, 256>}]} {
    %c0 = arith.constant 0 : index
    %c0_0 = arith.constant 0 : index
    %0 = vector.load %arg2[%c0, %c0_0] : memref<1x256xf32, #tpu.memory_space<vmem>>, vector<1x256xf32>
    %1 = vector.shape_cast %0 : vector<1x256xf32> to vector<1x256xf32>
    %2 = vector.broadcast %1 : vector<1x256xf32> to vector<2x256xf32>
    %c0_1 = arith.constant 0 : index
    %c0_2 = arith.constant 0 : index
    %3 = vector.load %arg3[%c0_1, %c0_2] : memref<2x256xf32, #tpu.memory_space<vmem>>, vector<2x256xf32>
    tpu.vector_store %arg3[%c0_1, %c0_2], %2 {strides = array<i32>} : memref<2x256xf32, #tpu.memory_space<vmem>>, vector<2x256xf32>,
    return
  }
  func.func @transform_0(%arg0: i32, %arg1: i32) -> (i32, i32) {
    %c0_i32 = arith.constant 0 : i32
    %c0_i32_0 = arith.constant 0 : i32
    return %c0_i32, %arg1 : i32, i32
  }
  func.func @transform_1(%arg0: i32, %arg1: i32) -> (i32, i32) {
    %c0_i32 = arith.constant 0 : i32
    return %arg0, %arg1 : i32, i32
  }
}

</mosaic_0001>

<bundles_post_ra>
// kernel: tpu_custom_call.1
= control target key start
LH: loop header
LB: loop body
LE: loop exit
PB: predicated region body
PF: predicated region fallthrough
CT: control target
= control target key end

     0   :  { %6 = vsyncpa [#allocation3], 0  ;;  %s143_s0 = inlined_call_operand.hbm [shape: f32[1,256], index: 0, kind: input, shape index: {}]   ;;  %s144_s1 = inlined_call_operand.hbm [shape: f32[2,256], index: 1, kind: output, shape index: {}]  }
   0x1   :  { %7 = vsyncpa [#allocation4], 0  ;;  %s107_s6 = smov [#allocation2]   ;;  %s59_s10 = scalar_lea.hbm %s143_s0, 32 }
   0x2   :  { %s14_s7 = sshll.u32 %s107_s6, 4  ;;  %p60_p0 = scmp.ne.s32.totalorder %s143_s0, %s59_s10  ;;  %s15_s7 = int_to_ptr.vmem [resolvable:$true] %s14_s7 }
   0x3   :  { %p63_p1 = scmp.lt.u32.totalorder %s59_s10, %s143_s0 }
   0x5   :  { %p65_p2 = pnand %p63_p1, %p60_p0 }
   0x7   :  { %68 = shalt.err (!%p65_p2)
}
   0x8   :  { %s69_s15 = scalar_lea.vmem %s15_s7, 32  ;;  %p74_p4 = scmp.lt.s32.totalorder %s15_s7, %s15_s7 }
   0x9   :  { %p70_p3 = scmp.ne.s32.totalorder %s15_s7, %s69_s15  ;;  %p75_p5 = scmp.lt.s32.totalorder %s69_s15, %s69_s15 }
   0xb   :  { %p76_p6 = por %p75_p5, %p74_p4 }
   0xd   :  { %p77_p7 = pnand %p76_p6, %p70_p3 }
   0xf   :  { %80 = shalt.err (!%p77_p7)
}
  0x10   :  { %17 = dma.hbm_to_vmem [thread:$0]  %s143_s0, 32, %s15_s7, [#allocation3]  }
  0x11   :  { %103 = dma.done.wait [#allocation3], 32  }
  0x12   :  { %104 = vsyncadd [#allocation3], 4294967264  ;;  %v23_v0 = vlaneseq  ;;  %v21_v4 = vld [vmem:[#allocation2] sm:$0x3]  ;;  %s108_s18 = smov [#allocation5]  }
  0x13   :  { %s47_s19 = sshll.u32 %s108_s18, 4  ;;  %s48_s19 = int_to_ptr.vmem [resolvable:$true] %s47_s19 }
  0x14   :  { %v24_v1 = vshrl.u32 %v23_v0, 7  ;;  %s81_s20 = scalar_lea.vmem %s48_s19, 64  ;;  %p86_p9 = scmp.lt.s32.totalorder %s48_s19, %s48_s19 }
  0x15   :  { %p82_p8 = scmp.ne.s32.totalorder %s48_s19, %s81_s20  ;;  %p87_p10 = scmp.lt.s32.totalorder %s81_s20, %s81_s20 }
  0x16   :  { %v25_v2 = vsub.s32 0, %v24_v1  ;;  %v29_v3 = vsub.s32 1, %v24_v1 }
  0x17   :  { %p88_p11 = por %p87_p10, %p86_p9 }
  0x18   :  { %v26_v5 = vrot.slane %v21_v4, %v25_v2  ;;  %v30_v6 = vrot.slane %v21_v4, %v29_v3 }
  0x19   :  { %p89_p12 = pnand %p88_p11, %p82_p8 }
  0x1a   :  { %v31_v7 = vcombine.low %v26_v5, %v30_v6 }
  0x1c   :  { %56 = vst.sshfl [vmem:[#allocation5] sm:$0x33 pattern:$0x76325410] %v31_v7 }
  0x1d   :  { %92 = shalt.err (!%p89_p12)
}
  0x1e   :  { %s93_s22 = scalar_lea.hbm %s144_s1, 64 }
  0x1f   :  { %p94_p13 = scmp.ne.s32.totalorder %s144_s1, %s93_s22  ;;  %p97_p0 = scmp.lt.u32.totalorder %s93_s22, %s144_s1 }
  0x21   :  { %p99_p1 = pnand %p97_p0, %p94_p13 }
  0x23   :  { %102 = shalt.err (!%p99_p1)
}
  0x24   :  { %50 = dma.vmem_to_hbm [thread:$0]  %s48_s19, 64, %s144_s1, [#allocation4]  }
  0x25   :  { %105 = dma.done.wait [#allocation4], 64  }
  0x26   :  { %106 = vsyncadd [#allocation4], 4294967232 }
  0x27   :  { %54 = vsyncpa [#allocation3], 1 }
  0x28   :  { %55 = vsyncpa [#allocation4], 1 }

</bundles_post_ra>
